<compile_context>
chip_gen: v6e
topology: v6e:2x2x1
jax: 0.10.0
libtpu: 0.0.40
codegen_flags: <defaults>
</compile_context>

<pallas_src>
import functools

import jax
import jax.numpy as jnp
from jax.experimental import pallas as pl
from jax.experimental.pallas import tpu as pltpu

EPS = 1e-5
LANE = 128


def _bn_relu(h, p):
    """h: (B, N) f32 pre-activation. p: (3, N) f32 rows = [bias, gamma, beta]."""
    h = h + p[0:1, :]
    mu = jnp.mean(h, axis=0, keepdims=True)
    d = h - mu                                    # two-pass (stable) variance
    var = jnp.mean(d * d, axis=0, keepdims=True)  # biased var, training-mode BN
    h = d * jax.lax.rsqrt(var + EPS) * p[1:2, :] + p[2:3, :]
    return jnp.maximum(h, 0.0)


def _projection_head_kernel(x_ref, w1_ref, p1_ref, w2_ref, p2_ref,
                            w3_ref, b3_ref, o_ref):
    # Layer 1: Linear -> BatchNorm1d (batch stats) -> ReLU.
    # x arrives f32; cast to bf16 on the VPU right before the MXU. Accumulation
    # is f32; all BN / bias / ReLU arithmetic stays f32.
    x = x_ref[...].astype(jnp.bfloat16)
    h = jnp.dot(x, w1_ref[...], preferred_element_type=jnp.float32)
    h = _bn_relu(h, p1_ref[...]).astype(jnp.bfloat16)

    # Layer 2: Linear -> BN -> ReLU. Hidden stays in VMEM/vregs (no HBM trip).
    h = jnp.dot(h, w2_ref[...], preferred_element_type=jnp.float32)
    h = _bn_relu(h, p2_ref[...]).astype(jnp.bfloat16)

    # Layer 3: plain Linear.
    out = jnp.dot(h, w3_ref[...], preferred_element_type=jnp.float32)
    o_ref[...] = (out + b3_ref[...]).astype(o_ref.dtype)


def _pad_axis(a, axis, multiple=LANE):
    pad = (-a.shape[axis]) % multiple
    if pad == 0:
        return a
    widths = [(0, 0)] * a.ndim
    widths[axis] = (0, pad)
    return jnp.pad(a, widths)


def prepare_params(params):
    """One-time parameter prep (hoisted out of the forward path):
    lane-pad every feature axis to a multiple of 128, cast weights to bf16
    (MXU operand format), pack bias/gamma/beta into a single (3, N) f32 operand
    per BN layer. Padded entries are zero -> numerically inert."""
    def pad_w(w):
        return _pad_axis(_pad_axis(w, 0), 1).astype(jnp.bfloat16)

    def pack3(b, g, be):
        return jnp.stack([_pad_axis(b, 0), _pad_axis(g, 0), _pad_axis(be, 0)], 0)

    prepped = dict(
        w1=pad_w(params["w1"]),
        p1=pack3(params["b1"], params["g1"], params["be1"]),
        w2=pad_w(params["w2"]),
        p2=pack3(params["b2"], params["g2"], params["be2"]),
        w3=pad_w(params["w3"]),
        b3=_pad_axis(params["b3"], 0).reshape(1, -1),
    )
    out_dim = params["w3"].shape[1]
    return prepped, out_dim


def projection_head_forward(x, prepped, *, out_dim):
    """x: (B, D_in) float32. Returns (B, out_dim) float32."""
    B = x.shape[0]
    xp = _pad_axis(x, 1)                      # keep f32; bf16 cast happens in-kernel
    k1, n1 = prepped["w1"].shape
    n2 = prepped["w2"].shape[1]
    n3 = prepped["w3"].shape[1]

    flops = 2 * B * (k1 * n1 + n1 * n2 + n2 * n3)
    bytes_accessed = (xp.size * 4
                      + (prepped["w1"].size + prepped["w2"].size
                         + prepped["w3"].size) * 2
                      + (prepped["p1"].size + prepped["p2"].size
                         + prepped["b3"].size) * 4
                      + B * n3 * 4)

    vmem_spec = pl.BlockSpec(memory_space=pltpu.MemorySpace.VMEM)
    out = pl.pallas_call(
        _projection_head_kernel,
        out_shape=jax.ShapeDtypeStruct((B, n3), x.dtype),
        in_specs=[vmem_spec] * 7,
        out_specs=vmem_spec,
        cost_estimate=pl.CostEstimate(flops=flops,
                                      transcendentals=n1 + n2,
                                      bytes_accessed=bytes_accessed),
    )(xp, prepped["w1"], prepped["p1"], prepped["w2"], prepped["p2"],
      prepped["w3"], prepped["b3"])
    return out[:, :out_dim]


def init_params(key, input_dim, hidden_dim, output_dim):
    """Deterministic init (Linear: U(-1/sqrt(fan_in), +), BN: gamma=1, beta=0)."""
    ks = jax.random.split(key, 6)

    def linear(kw, kb, fan_in, fan_out):
        bound = 1.0 / jnp.sqrt(fan_in)
        w = jax.random.uniform(kw, (fan_in, fan_out), jnp.float32, -bound, bound)
        b = jax.random.uniform(kb, (fan_out,), jnp.float32, -bound, bound)
        return w, b

    w1, b1 = linear(ks[0], ks[1], input_dim, hidden_dim)
    w2, b2 = linear(ks[2], ks[3], hidden_dim, hidden_dim)
    w3, b3 = linear(ks[4], ks[5], hidden_dim, output_dim)
    return dict(
        w1=w1, b1=b1,
        g1=jnp.ones((hidden_dim,), jnp.float32),
        be1=jnp.zeros((hidden_dim,), jnp.float32),
        w2=w2, b2=b2,
        g2=jnp.ones((hidden_dim,), jnp.float32),
        be2=jnp.zeros((hidden_dim,), jnp.float32),
        w3=w3, b3=b3,
    )


def reference_forward(x, p):
    """Plain-JAX reference mirroring the PyTorch training-mode forward, with the
    same bf16 casting at matmul boundaries as the kernel (f32 accumulation)."""
    def bdot(a, b):
        return jnp.dot(a.astype(jnp.bfloat16), b.astype(jnp.bfloat16),
                       preferred_element_type=jnp.float32)

    h = bdot(x, p["w1"]) + p["b1"]
    mu, var = h.mean(0), h.var(0)          # biased variance, eps=1e-5
    h = jnp.maximum((h - mu) / jnp.sqrt(var + EPS) * p["g1"] + p["be1"], 0.0)
    h = bdot(h, p["w2"]) + p["b2"]
    mu, var = h.mean(0), h.var(0)
    h = jnp.maximum((h - mu) / jnp.sqrt(var + EPS) * p["g2"] + p["be2"], 0.0)
    return bdot(h, p["w3"]) + p["b3"]


if __name__ == "__main__":
    # Small shapes consistent with the module (scaled down from 1280/512/128).
    # Non-multiples of 128 exercise the lane-padding + final slice path.
    B, INPUT_DIM, HIDDEN_DIM, OUTPUT_DIM = 32, 320, 192, 96

    key = jax.random.PRNGKey(0)
    kx, kp = jax.random.split(key)
    x = jax.random.normal(kx, (B, INPUT_DIM), jnp.float32)
    params = init_params(kp, INPUT_DIM, HIDDEN_DIM, OUTPUT_DIM)

    # One-time weight prep (padding / bf16 cast / packing) hoisted out of forward.
    prepped, out_dim = prepare_params(params)
    fwd = jax.jit(functools.partial(projection_head_forward, out_dim=out_dim))

    out = jax.block_until_ready(fwd(x, prepped))

    ref = reference_forward(x, params)
    assert out.shape == (B, OUTPUT_DIM)
    assert jnp.allclose(out, ref, atol=3e-2, rtol=3e-2), "mismatch vs reference"

    print("KERNEL_OK")
</pallas_src>

<mosaic_0001>
module attributes {stable_mosaic.version = 11 : i64} {
  func.func @_projection_head_kernel(%arg0: memref<32x384xf32, #tpu.memory_space<vmem>>, %arg1: memref<384x256xbf16, #tpu.memory_space<vmem>>, %arg2: memref<3x256xf32, #tpu.memory_space<vmem>>, %arg3: memref<256x256xbf16, #tpu.memory_space<vmem>>, %arg4: memref<3x256xf32, #tpu.memory_space<vmem>>, %arg5: memref<256x128xbf16, #tpu.memory_space<vmem>>, %arg6: memref<1x128xf32, #tpu.memory_space<vmem>>, %arg7: memref<32x128xf32, #tpu.memory_space<vmem>>) attributes {dimension_semantics = [], scalar_prefetch = 0 : i64, scratch_operands = 0 : i64, tpu.core_type = #tpu.core_type<tc>} {
    %c0 = arith.constant 0 : index
    %c0_0 = arith.constant 0 : index
    %0 = vector.load %arg0[%c0, %c0_0] : memref<32x384xf32, #tpu.memory_space<vmem>>, vector<32x384xf32>
    %1 = arith.truncf %0 : vector<32x384xf32> to vector<32x384xbf16>
    %c0_1 = arith.constant 0 : index
    %c0_2 = arith.constant 0 : index
    %2 = vector.load %arg1[%c0_1, %c0_2] : memref<384x256xbf16, #tpu.memory_space<vmem>>, vector<384x256xbf16>
    %cst = arith.constant dense<0.000000e+00> : vector<32x256xf32>
    %3 = tpu.matmul %1, %2, %cst {dimension_numbers = #tpu.dot_dimension_numbers<[1], [0], [0], [1], [0, 0, 1, 1], [], []>} : vector<32x384xbf16>, vector<384x256xbf16>, vector<32x256xf32> -> vector<32x256xf32>
    %c0_3 = arith.constant 0 : index
    %c0_4 = arith.constant 0 : index
    %4 = vector.load %arg2[%c0_3, %c0_4] : memref<3x256xf32, #tpu.memory_space<vmem>>, vector<3x256xf32>
    %5 = vector.extract_strided_slice %4 {offsets = [0, 0], sizes = [1, 256], strides = [1, 1]} : vector<3x256xf32> to vector<1x256xf32>
    %6 = vector.broadcast %5 : vector<1x256xf32> to vector<32x256xf32>
    %7 = arith.addf %3, %6 : vector<32x256xf32>
    %cst_5 = arith.constant dense<0.000000e+00> : vector<256xf32>
    %8 = vector.multi_reduction <add>, %7, %cst_5 [0] : vector<32x256xf32> to vector<256xf32>
    %9 = vector.shape_cast %8 : vector<256xf32> to vector<1x256xf32>
    %cst_6 = arith.constant 3.200000e+01 : f32
    %10 = vector.broadcast %cst_6 : f32 to vector<1x256xf32>
    %11 = arith.divf %9, %10 : vector<1x256xf32>
    %12 = vector.broadcast %11 : vector<1x256xf32> to vector<32x256xf32>
    %13 = arith.subf %7, %12 : vector<32x256xf32>
    %14 = arith.mulf %13, %13 : vector<32x256xf32>
    %cst_7 = arith.constant dense<0.000000e+00> : vector<256xf32>
    %15 = vector.multi_reduction <add>, %14, %cst_7 [0] : vector<32x256xf32> to vector<256xf32>
    %16 = vector.shape_cast %15 : vector<256xf32> to vector<1x256xf32>
    %cst_8 = arith.constant 3.200000e+01 : f32
    %17 = vector.broadcast %cst_8 : f32 to vector<1x256xf32>
    %18 = arith.divf %16, %17 : vector<1x256xf32>
    %cst_9 = arith.constant 9.99999974E-6 : f32
    %19 = vector.broadcast %cst_9 : f32 to vector<1x256xf32>
    %20 = arith.addf %18, %19 : vector<1x256xf32>
    %21 = math.rsqrt %20 : vector<1x256xf32>
    %22 = vector.broadcast %21 : vector<1x256xf32> to vector<32x256xf32>
    %23 = arith.mulf %13, %22 : vector<32x256xf32>
    %24 = vector.extract_strided_slice %4 {offsets = [1, 0], sizes = [1, 256], strides = [1, 1]} : vector<3x256xf32> to vector<1x256xf32>
    %25 = vector.broadcast %24 : vector<1x256xf32> to vector<32x256xf32>
    %26 = arith.mulf %23, %25 : vector<32x256xf32>
    %27 = vector.extract_strided_slice %4 {offsets = [2, 0], sizes = [1, 256], strides = [1, 1]} : vector<3x256xf32> to vector<1x256xf32>
    %28 = vector.broadcast %27 : vector<1x256xf32> to vector<32x256xf32>
    %29 = arith.addf %26, %28 : vector<32x256xf32>
    %cst_10 = arith.constant 0.000000e+00 : f32
    %30 = vector.broadcast %cst_10 : f32 to vector<32x256xf32>
    %31 = arith.maximumf %29, %30 : vector<32x256xf32>
    %32 = arith.truncf %31 : vector<32x256xf32> to vector<32x256xbf16>
    %c0_11 = arith.constant 0 : index
    %c0_12 = arith.constant 0 : index
    %33 = vector.load %arg3[%c0_11, %c0_12] : memref<256x256xbf16, #tpu.memory_space<vmem>>, vector<256x256xbf16>
    %cst_13 = arith.constant dense<0.000000e+00> : vector<32x256xf32>
    %34 = tpu.matmul %32, %33, %cst_13 {dimension_numbers = #tpu.dot_dimension_numbers<[1], [0], [0], [1], [0, 0, 1, 1], [], []>} : vector<32x256xbf16>, vector<256x256xbf16>, vector<32x256xf32> -> vector<32x256xf32>
    %c0_14 = arith.constant 0 : index
    %c0_15 = arith.constant 0 : index
    %35 = vector.load %arg4[%c0_14, %c0_15] : memref<3x256xf32, #tpu.memory_space<vmem>>, vector<3x256xf32>
    %36 = vector.extract_strided_slice %35 {offsets = [0, 0], sizes = [1, 256], strides = [1, 1]} : vector<3x256xf32> to vector<1x256xf32>
    %37 = vector.broadcast %36 : vector<1x256xf32> to vector<32x256xf32>
    %38 = arith.addf %34, %37 : vector<32x256xf32>
    %cst_16 = arith.constant dense<0.000000e+00> : vector<256xf32>
    %39 = vector.multi_reduction <add>, %38, %cst_16 [0] : vector<32x256xf32> to vector<256xf32>
    %40 = vector.shape_cast %39 : vector<256xf32> to vector<1x256xf32>
    %cst_17 = arith.constant 3.200000e+01 : f32
    %41 = vector.broadcast %cst_17 : f32 to vector<1x256xf32>
    %42 = arith.divf %40, %41 : vector<1x256xf32>
    %43 = vector.broadcast %42 : vector<1x256xf32> to vector<32x256xf32>
    %44 = arith.subf %38, %43 : vector<32x256xf32>
    %45 = arith.mulf %44, %44 : vector<32x256xf32>
    %cst_18 = arith.constant dense<0.000000e+00> : vector<256xf32>
    %46 = vector.multi_reduction <add>, %45, %cst_18 [0] : vector<32x256xf32> to vector<256xf32>
    %47 = vector.shape_cast %46 : vector<256xf32> to vector<1x256xf32>
    %cst_19 = arith.constant 3.200000e+01 : f32
    %48 = vector.broadcast %cst_19 : f32 to vector<1x256xf32>
    %49 = arith.divf %47, %48 : vector<1x256xf32>
    %cst_20 = arith.constant 9.99999974E-6 : f32
    %50 = vector.broadcast %cst_20 : f32 to vector<1x256xf32>
    %51 = arith.addf %49, %50 : vector<1x256xf32>
    %52 = math.rsqrt %51 : vector<1x256xf32>
    %53 = vector.broadcast %52 : vector<1x256xf32> to vector<32x256xf32>
    %54 = arith.mulf %44, %53 : vector<32x256xf32>
    %55 = vector.extract_strided_slice %35 {offsets = [1, 0], sizes = [1, 256], strides = [1, 1]} : vector<3x256xf32> to vector<1x256xf32>
    %56 = vector.broadcast %55 : vector<1x256xf32> to vector<32x256xf32>
    %57 = arith.mulf %54, %56 : vector<32x256xf32>
    %58 = vector.extract_strided_slice %35 {offsets = [2, 0], sizes = [1, 256], strides = [1, 1]} : vector<3x256xf32> to vector<1x256xf32>
    %59 = vector.broadcast %58 : vector<1x256xf32> to vector<32x256xf32>
    %60 = arith.addf %57, %59 : vector<32x256xf32>
    %cst_21 = arith.constant 0.000000e+00 : f32
    %61 = vector.broadcast %cst_21 : f32 to vector<32x256xf32>
    %62 = arith.maximumf %60, %61 : vector<32x256xf32>
    %63 = arith.truncf %62 : vector<32x256xf32> to vector<32x256xbf16>
    %c0_22 = arith.constant 0 : index
    %c0_23 = arith.constant 0 : index
    %64 = vector.load %arg5[%c0_22, %c0_23] : memref<256x128xbf16, #tpu.memory_space<vmem>>, vector<256x128xbf16>
    %cst_24 = arith.constant dense<0.000000e+00> : vector<32x128xf32>
    %65 = tpu.matmul %63, %64, %cst_24 {dimension_numbers = #tpu.dot_dimension_numbers<[1], [0], [0], [1], [0, 0, 1, 1], [], []>} : vector<32x256xbf16>, vector<256x128xbf16>, vector<32x128xf32> -> vector<32x128xf32>
    %c0_25 = arith.constant 0 : index
    %c0_26 = arith.constant 0 : index
    %66 = vector.load %arg6[%c0_25, %c0_26] : memref<1x128xf32, #tpu.memory_space<vmem>>, vector<1x128xf32>
    %67 = vector.broadcast %66 : vector<1x128xf32> to vector<32x128xf32>
    %68 = arith.addf %65, %67 : vector<32x128xf32>
    %c0_27 = arith.constant 0 : index
    %c0_28 = arith.constant 0 : index
    %69 = vector.load %arg7[%c0_27, %c0_28] : memref<32x128xf32, #tpu.memory_space<vmem>>, vector<32x128xf32>
    tpu.vector_store %arg7[%c0_27, %c0_28], %68 {strides = array<i32>} : memref<32x128xf32, #tpu.memory_space<vmem>>, vector<32x128xf32>,
    return
  }
}

</mosaic_0001>

<bundles_post_ra>
// kernel: projection_head_forward.1
= control target key start
LH: loop header
LB: loop body
LE: loop exit
PB: predicated region body
PF: predicated region fallthrough
CT: control target
= control target key end

     0   :  { %12 = vsyncpa [#allocation3], 0  ;;  %s1789_s0 = inlined_call_operand.vmem [shape: f32[32,384], index: 0, kind: input, shape index: {}]   ;;  %s1790_s1 = inlined_call_operand.hbm [shape: bf16[384,256], index: 1, kind: input, shape index: {}]   ;;  %s1791_s2 = inlined_call_operand.vmem [shape: f32[3,256], index: 2, kind: input, shape index: {}]   ;;  %s1792_s3 = inlined_call_operand.hbm [shape: bf16[256,256], index: 3, kind: input, shape index: {}]   ;;  %s1793_s4 = inlined_call_operand.vmem [shape: f32[3,256], index: 4, kind: input, shape index: {}]   ;;  %s1794_s5 = inlined_call_operand.vmem [shape: bf16[256,128], index: 5, kind: input, shape index: {}]   ;;  %s1795_s6 = inlined_call_operand.vmem [shape: f32[1,128], index: 6, kind: input, shape index: {}]   ;;  %s1796_s7 = inlined_call_operand.hbm [shape: f32[32,128], index: 7, kind: output, shape index: {}]  }
   0x1   :  { %13 = vsyncpa [#allocation6], 0 }
   0x2   :  { %14 = vsyncpa [#allocation4], 0  ;;  %s1565_s24 = smov [#allocation2]  }
   0x3   :  { %s22_s25 = sshll.u32 %s1565_s24, 4  ;;  %s23_s25 = int_to_ptr.vmem [resolvable:$true] %s22_s25 }
   0x4   :  { %s1507_s26 = scalar_lea.vmem %s23_s25, 6144  ;;  %p1512_p1 = scmp.lt.s32.totalorder %s23_s25, %s23_s25 }
   0x5   :  { %p1508_p0 = scmp.ne.s32.totalorder %s23_s25, %s1507_s26  ;;  %p1513_p2 = scmp.lt.s32.totalorder %s1507_s26, %s1507_s26 }
   0x7   :  { %p1514_p3 = por %p1513_p2, %p1512_p1 }
   0x9   :  { %p1515_p4 = pnand %p1514_p3, %p1508_p0 }
   0xb   :  { %1518 = shalt.err (!%p1515_p4)
}
   0xc   :  { %s1566_s27 = smov 128   ;;  %s1567_s28 = smov 8  }
   0xd   :  { %28 = dma.hbm_to_vmem [thread:$0]  %s1790_s1, 6144, %s23_s25, [#allocation3], %s1566_s27, %s1566_s27, %s1567_s28  }
   0xe   :  { %s1568_s8 = smov [#allocation5]  }
   0xf   :  { %s36_s9 = sshll.u32 %s1568_s8, 4  ;;  %s37_s9 = int_to_ptr.vmem [resolvable:$true] %s36_s9 }
  0x10   :  { %s1527_s10 = scalar_lea.vmem %s37_s9, 4096  ;;  %p1532_p6 = scmp.lt.s32.totalorder %s37_s9, %s37_s9 }
  0x11   :  { %p1528_p5 = scmp.ne.s32.totalorder %s37_s9, %s1527_s10  ;;  %p1533_p7 = scmp.lt.s32.totalorder %s1527_s10, %s1527_s10 }
  0x13   :  { %p1534_p8 = por %p1533_p7, %p1532_p6 }
  0x15   :  { %p1535_p9 = pnand %p1534_p8, %p1528_p5 }
  0x17   :  { %1538 = shalt.err (!%p1535_p9)
}
  0x18   :  { %42 = dma.hbm_to_vmem [thread:$0]  %s1792_s3, 4096, %s37_s9, [#allocation6], %s1566_s27, %s1566_s27, %s1567_s28  }
  0x19   :  { %1559 = dma.done.wait [#allocation3], 6144  }
  0x1a   :  { %1560 = vsyncadd [#allocation3], 4294961152 }
  0x1b   :  { %1561 = dma.done.wait [#allocation6], 4096  }
  0x1c   :  { %1562 = vsyncadd [#allocation6], 4294963200  ;;  %v1569_v0 = vmov 0   ;;  %v1355_v1 = vld [vmem:[#allocation2 + $0x74] ss:$8 sps:$4 sm:$0xff]   ;;  %v57_v33 = vld [vmem:[%s1789_s0 + $0x8] sm:$0xff] }
  0x1d   :  { %467 = vmatprep.mubr.bf16.mxu1 %v1569_v0  ;;  %v1357_v2 = vld [vmem:[#allocation2 + $0x70] ss:$8 sps:$4 sm:$0xff]   ;;  %382 = vmatprep.subr.bf16.mxu0 %v1355_v1  ;;  %v1358_v3 = vld [vmem:[#allocation2 + $0x64] ss:$8 sps:$4 sm:$0xff]   ;;  %v1360_v4 = vld [vmem:[#allocation2 + $0x60] ss:$8 sps:$4 sm:$0xff]  }
  0x1e   :  { %383 = vmatpush1.bf16.msra.mxu0 %v1357_v2  ;;  %v1361_v5 = vld [vmem:[#allocation2 + $0x54] ss:$8 sps:$4 sm:$0xff]   ;;  %v1363_v6 = vld [vmem:[#allocation2 + $0x50] ss:$8 sps:$4 sm:$0xff]   ;;  %v1364_v7 = vld [vmem:[#allocation2 + $0x44] ss:$8 sps:$4 sm:$0xff]  }
  0x1f   :  { %384 = vmatprep.subr.bf16.mxu0 %v1358_v3  ;;  %v1366_v8 = vld [vmem:[#allocation2 + $0x40] ss:$8 sps:$4 sm:$0xff]   ;;  %v1378_v9 = vld [vmem:[#allocation2 + $0x174] ss:$8 sps:$4 sm:$0xff]   ;;  %v1381_v10 = vld [vmem:[#allocation2 + $0x170] ss:$8 sps:$4 sm:$0xff]  }
  0x20   :  { %v1367_v11 = vld [vmem:[#allocation2 + $0x34] ss:$8 sps:$4 sm:$0xff]   ;;  %435 = vmatprep.subr.bf16.mxu1 %v1378_v9  ;;  %v1384_v12 = vld [vmem:[#allocation2 + $0x164] ss:$8 sps:$4 sm:$0xff]   ;;  %v1387_v13 = vld [vmem:[#allocation2 + $0x160] ss:$8 sps:$4 sm:$0xff]  }
  0x21   :  { %436 = vmatpush1.bf16.msra.mxu1 %v1381_v10  ;;  %v1369_v14 = vld [vmem:[#allocation2 + $0x30] ss:$8 sps:$4 sm:$0xff]   ;;  %v1370_v15 = vld [vmem:[#allocation2 + $0x24] ss:$8 sps:$4 sm:$0xff]   ;;  %v1390_v16 = vld [vmem:[#allocation2 + $0x154] ss:$8 sps:$4 sm:$0xff]  }
  0x22   :  { %385 = vmatpush1.bf16.msra.mxu0 %v1360_v4  ;;  %437 = vmatprep.subr.bf16.mxu1 %v1384_v12  ;;  %v1393_v17 = vld [vmem:[#allocation2 + $0x150] ss:$8 sps:$4 sm:$0xff]   ;;  %v1372_v18 = vld [vmem:[#allocation2 + $0x20] ss:$8 sps:$4 sm:$0xff]   ;;  %v1396_v19 = vld [vmem:[#allocation2 + $0x144] ss:$8 sps:$4 sm:$0xff]  }
  0x23   :  { %386 = vmatprep.subr.bf16.mxu0 %v1361_v5  ;;  %v1373_v20 = vld [vmem:[#allocation2 + $0x14] ss:$8 sps:$4 sm:$0xff]   ;;  %v1375_v21 = vld [vmem:[#allocation2 + $0x10] ss:$8 sps:$4 sm:$0xff]   ;;  %v1399_v22 = vld [vmem:[#allocation2 + $0x140] ss:$8 sps:$4 sm:$0xff]  }
  0x24   :  { %v1402_v23 = vld [vmem:[#allocation2 + $0x134] ss:$8 sps:$4 sm:$0xff]   ;;  %v1376_v24 = vld [vmem:[#allocation2 + $0x4] ss:$8 sps:$4 sm:$0xff]   ;;  %v1405_v25 = vld [vmem:[#allocation2 + $0x130] ss:$8 sps:$4 sm:$0xff]  }
  0x25   :  { %438 = vmatpush1.bf16.msra.mxu1 %v1387_v13  ;;  %v1380_v26 = vld [vmem:[#allocation2] ss:$8 sps:$4 sm:$0xff]   ;;  %v1408_v27 = vld [vmem:[#allocation2 + $0x124] ss:$8 sps:$4 sm:$0xff]   ;;  %v1382_v28 = vld [vmem:[#allocation2 + $0xf4] ss:$8 sps:$4 sm:$0xff]  }
  0x26   :  { %387 = vmatpush1.bf16.msra.mxu0 %v1363_v6  ;;  %439 = vmatprep.subr.bf16.mxu1 %v1390_v16  ;;  %v1411_v29 = vld [vmem:[#allocation2 + $0x120] ss:$8 sps:$4 sm:$0xff]   ;;  %v1386_v30 = vld [vmem:[#allocation2 + $0xf0] ss:$8 sps:$4 sm:$0xff]   ;;  %v1414_v31 = vld [vmem:[#allocation2 + $0x114] ss:$8 sps:$4 sm:$0xff]  }
  0x27   :  { %388 = vmatprep.subr.bf16.mxu0 %v1364_v7  ;;  %v1388_v32 = vld [vmem:[#allocation2 + $0xe4] ss:$8 sps:$4 sm:$0xff]   ;;  %v1417_v35 = vld [vmem:[#allocation2 + $0x110] ss:$8 sps:$4 sm:$0xff]   ;;  %v1392_v37 = vld [vmem:[#allocation2 + $0xe0] ss:$8 sps:$4 sm:$0xff]  }
  0x28   :  { %v60_v34 = vld [vmem:[%s1789_s0 + $0x20] sm:$0xff]  ;;  %v1394_v38 = vld [vmem:[#allocation2 + $0xd4] ss:$8 sps:$4 sm:$0xff]   ;;  %v61_v42 = vld [vmem:[%s1789_s0 + $0x28] sm:$0xff]  ;;  %s1570_s21 = smov [#allocation7]  }
  0x29   :  { %440 = vmatpush1.bf16.msra.mxu1 %v1393_v17  ;;  %v69_v36 = vpack.c.bf16 %v60_v34, %v57_v33  ;;  %v1420_v39 = vld [vmem:[#allocation2 + $0x104] ss:$8 sps:$4 sm:$0xff]   ;;  %v1423_v40 = vld [vmem:[#allocation2 + $0x100] ss:$8 sps:$4 sm:$0xff]   ;;  %v58_v41 = vld [vmem:[%s1789_s0 + $0x10] sm:$0xff]  ;;  %s1211_s22 = sshll.u32 %s1570_s21, 4  ;;  %s1212_s22 = int_to_ptr.vmem [resolvable:$true] %s1211_s22 }
  0x2a   :  { %389 = vmatpush1.bf16.msra.mxu0 %v1366_v8  ;;  %441 = vmatprep.subr.bf16.mxu1 %v1396_v19  ;;  %v1398_v43 = vld [vmem:[#allocation2 + $0xd0] ss:$8 sps:$4 sm:$0xff]   ;;  %v1400_v44 = vld [vmem:[#allocation2 + $0xc4] ss:$8 sps:$4 sm:$0xff]   ;;  %v1404_v45 = vld [vmem:[#allocation2 + $0xc0] ss:$8 sps:$4 sm:$0xff]   ;;  %v70_v46 = vpack.c.bf16 %v61_v42, %v58_v41  ;;  %p1544_p11 = scmp.lt.s32.totalorder %s1212_s22, %s1212_s22 }
  0x2b   :  { %390 = vmatprep.subr.bf16.mxu0 %v1367_v11  ;;  %414 = vmatprep.mubr.bf16.mxu0 %v69_v36  ;;  %v1406_v47 = vld [vmem:[#allocation2 + $0xb4] ss:$8 sps:$4 sm:$0xff]   ;;  %v64_v48 = vld [vmem:[%s1789_s0 + $0x40] sm:$0xff]  ;;  %v1410_v50 = vld [vmem:[#allocation2 + $0xb0] ss:$8 sps:$4 sm:$0xff]  }
  0x2c   :  { %v67_v49 = vld [vmem:[%s1789_s0 + $0x58] sm:$0xff]  ;;  %v1412_v51 = vld [vmem:[#allocation2 + $0xa4] ss:$8 sps:$4 sm:$0xff]   ;;  %v1416_v52 = vld [vmem:[#allocation2 + $0xa0] ss:$8 sps:$4 sm:$0xff]  }
  0x2d   :  { %442 = vmatpush1.bf16.msra.mxu1 %v1399_v22  ;;  %v73_v53 = vpack.c.bf16 %v67_v49, %v64_v48  ;;  %v1418_v54 = vld [vmem:[#allocation2 + $0x94] ss:$8 sps:$4 sm:$0xff]   ;;  %v1422_v55 = vld [vmem:[#allocation2 + $0x90] ss:$8 sps:$4 sm:$0xff]   ;;  %v1424_v56 = vld [vmem:[#allocation2 + $0x84] ss:$8 sps:$4 sm:$0xff]  }
  0x2e   :  { %391 = vmatpush1.bf16.msra.mxu0 %v1369_v14  ;;  %443 = vmatprep.subr.bf16.mxu1 %v1402_v23  ;;  %v1426_v57 = vld [vmem:[#allocation2 + $0x80] ss:$8 sps:$4 sm:$0xff]   ;;  %v59_v59 = vld [vmem:[%s1789_s0 + $0x18] sm:$0xff]  ;;  %v66_v61 = vld [vmem:[%s1789_s0 + $0x50] sm:$0xff] }
  0x2f   :  { %392 = vmatprep.subr.bf16.mxu0 %v1370_v15  ;;  %v56_v58 = vld [vmem:[%s1789_s0] sm:$0xff]  ;;  %v63_v60 = vld [vmem:[%s1789_s0 + $0x38] sm:$0xff]  ;;  %v65_v1 = vld [vmem:[%s1789_s0 + $0x48] sm:$0xff] }
  0x30   :  { %v68_v62 = vpack.c.bf16 %v59_v59, %v56_v58  ;;  %v72_v63 = vpack.c.bf16 %v66_v61, %v63_v60  ;;  %v1429_v3 = vld [vmem:[#allocation5 + $0x74] ss:$8 sps:$4 sm:$0xff]   ;;  %v1427_v4 = vld [vmem:[#allocation5 + $0x70] ss:$8 sps:$4 sm:$0xff]   ;;  %v1432_v5 = vld [vmem:[#allocation5 + $0x64] ss:$8 sps:$4 sm:$0xff]  }
  0x31   :  { %444 = vmatpush1.bf16.msra.mxu1 %v1405_v25  ;;  %v1430_v6 = vld [vmem:[#allocation5 + $0x60] ss:$8 sps:$4 sm:$0xff]   ;;  %v1435_v7 = vld [vmem:[#allocation5 + $0x54] ss:$8 sps:$4 sm:$0xff]   ;;  %v1433_v8 = vld [vmem:[#allocation5 + $0x50] ss:$8 sps:$4 sm:$0xff]  }
  0x32   :  { %393 = vmatpush1.bf16.msra.mxu0 %v1372_v18  ;;  %445 = vmatprep.subr.bf16.mxu1 %v1408_v27  ;;  %v1438_v9 = vld [vmem:[#allocation5 + $0x44] ss:$8 sps:$4 sm:$0xff]   ;;  %v1436_v10 = vld [vmem:[#allocation5 + $0x40] ss:$8 sps:$4 sm:$0xff]   ;;  %v1441_v11 = vld [vmem:[#allocation5 + $0x34] ss:$8 sps:$4 sm:$0xff]  }
  0x33   :  { %394 = vmatprep.subr.bf16.mxu0 %v1373_v20  ;;  %v1439_v12 = vld [vmem:[#allocation5 + $0x30] ss:$8 sps:$4 sm:$0xff]   ;;  %v1444_v13 = vld [vmem:[#allocation5 + $0x24] ss:$8 sps:$4 sm:$0xff]   ;;  %v1442_v14 = vld [vmem:[#allocation5 + $0x20] ss:$8 sps:$4 sm:$0xff]  }
  0x34   :  { %v1447_v15 = vld [vmem:[#allocation5 + $0x14] ss:$8 sps:$4 sm:$0xff]   ;;  %v1445_v16 = vld [vmem:[#allocation5 + $0x10] ss:$8 sps:$4 sm:$0xff]   ;;  %v1450_v17 = vld [vmem:[#allocation5 + $0x4] ss:$8 sps:$4 sm:$0xff]  }
  0x35   :  { %446 = vmatpush1.bf16.msra.mxu1 %v1411_v29  ;;  %v1448_v18 = vld [vmem:[#allocation5] ss:$8 sps:$4 sm:$0xff]   ;;  %v1453_v19 = vld [vmem:[#allocation5 + $0xf4] ss:$8 sps:$4 sm:$0xff]   ;;  %v1451_v20 = vld [vmem:[#allocation5 + $0xf0] ss:$8 sps:$4 sm:$0xff]  }
  0x36   :  { %395 = vmatpush1.bf16.msra.mxu0 %v1375_v21  ;;  %447 = vmatprep.subr.bf16.mxu1 %v1414_v31  ;;  %v1456_v21 = vld [vmem:[#allocation5 + $0xe4] ss:$8 sps:$4 sm:$0xff]   ;;  %v1454_v22 = vld [vmem:[#allocation5 + $0xe0] ss:$8 sps:$4 sm:$0xff]   ;;  %v1459_v23 = vld [vmem:[#allocation5 + $0xd4] ss:$8 sps:$4 sm:$0xff]  }
  0x37   :  { %396 = vmatprep.subr.bf16.mxu0 %v1376_v24  ;;  %v1457_v24 = vld [vmem:[#allocation5 + $0xd0] ss:$8 sps:$4 sm:$0xff]   ;;  %v1462_v25 = vld [vmem:[#allocation5 + $0xc4] ss:$8 sps:$4 sm:$0xff]   ;;  %v1465_v27 = vld [vmem:[#allocation5 + $0xb4] ss:$8 sps:$4 sm:$0xff]  }
  0x38   :  { %v1468_v29 = vld [vmem:[#allocation5 + $0xa4] ss:$8 sps:$4 sm:$0xff]   ;;  %v1469_v31 = vld [vmem:[#allocation5 + $0x90] ss:$8 sps:$4 sm:$0xff]   ;;  %v1472_v34 = vld [vmem:[#allocation5 + $0x80] ss:$8 sps:$4 sm:$0xff]  }
  0x39   :  { %448 = vmatpush1.bf16.msra.mxu1 %v1417_v35  ;;  %v1474_v33 = vld [vmem:[#allocation5 + $0x84] ss:$8 sps:$4 sm:$0xff]   ;;  %v124_v35 = vlaneseq }
  0x3a   :  { %397 = vmatpush1.bf16.msra.mxu0 %v1380_v26  ;;  %449 = vmatprep.subr.bf16.mxu1 %v1420_v39  ;;  %v1460_v26 = vld [vmem:[#allocation5 + $0xc0] ss:$8 sps:$4 sm:$0xff]  }
  0x3b   :  { %398 = vmatprep.subr.bf16.mxu0 %v1382_v28  ;;  %v1463_v28 = vld [vmem:[#allocation5 + $0xb0] ss:$8 sps:$4 sm:$0xff]  }
  0x3d   :  { %450 = vmatpush1.bf16.msra.mxu1 %v1423_v40  ;;  %v1669_v40 = vld [vmem:[%s1791_s2] sm:$0x77] }
  0x3e   :  { %399 = vmatpush2.bf16.msra.mxu0 %v1386_v30  ;;  %833 = vmatprep.subr.bf16.mxu1 %v1429_v3  ;;  %v1466_v30 = vld [vmem:[#allocation5 + $0xa0] ss:$8 sps:$4 sm:$0xff]  }
  0x3f   :  { %400 = vmatprep.subr.bf16.mxu0 %v1388_v32  ;;  %v1471_v32 = vld [vmem:[#allocation5 + $0x94] ss:$8 sps:$4 sm:$0xff]  }
  0x40   :  { %468 = vmatmul.mubr.bf16.vlgmr.msra.gmra.mxu1 %v70_v46 }
  0x41   :  { %477 = vmatprep.mubr.bf16.mxu1 %v1569_v0  ;;  %v62_v0 = vld [vmem:[%s1789_s0 + $0x30] sm:$0xff]  ;;  %834 = vmatpush1.bf16.msra.mxu1 %v1427_v4 }
  0x42   :  { %401 = vmatpush2.bf16.msra.mxu0 %v1392_v37  ;;  %v71_v2 = vpack.c.bf16 %v65_v1, %v62_v0  ;;  %835 = vmatprep.subr.bf16.mxu1 %v1432_v5  ;;  %v1661_v37 = vshrl.u32 %v124_v35, 7 }
  0x43   :  { %402 = vmatprep.subr.bf16.mxu0 %v1394_v38 }
  0x44   :  { %v1664_v39 = vsub.s32 0, %v1661_v37  ;;  %v130_v42 = vsub.s32 4, %v1661_v37 }
  0x45   :  { %836 = vmatpush1.bf16.msra.mxu1 %v1430_v6 }
  0x46   :  { %403 = vmatpush2.bf16.msra.mxu0 %v1398_v43  ;;  %837 = vmatprep.subr.bf16.mxu1 %v1435_v7  ;;  %v127_v43 = vrot.slane %v1669_v40, %v1664_v39  ;;  %v131_v46 = vrot.slane %v1669_v40, %v130_v42 }
  0x47   :  { %404 = vmatprep.subr.bf16.mxu0 %v1400_v44 }
  0x48   :  { %478 = vmatmul.mubr.bf16.gmra.mxu1 %v73_v53  ;;  %v137_v48 = vrot.slane %v127_v43, %v1664_v39 }
  0x49   :  { %838 = vmatpush1.bf16.msra.mxu1 %v1433_v8 }
  0x4a   :  { %405 = vmatpush2.bf16.msra.mxu0 %v1404_v45  ;;  %839 = vmatprep.subr.bf16.mxu1 %v1438_v9 }
  0x4b   :  { %406 = vmatprep.subr.bf16.mxu0 %v1406_v47 }
  0x4d   :  { %840 = vmatpush1.bf16.msra.mxu1 %v1436_v10 }
  0x4e   :  { %407 = vmatpush2.bf16.msra.mxu0 %v1410_v50  ;;  %841 = vmatprep.subr.bf16.mxu1 %v1441_v11 }
  0x4f   :  { %408 = vmatprep.subr.bf16.mxu0 %v1412_v51  ;;  %v141_v51 = vrot.slane %v131_v46, %v1664_v39 }
  0x51   :  { %842 = vmatpush1.bf16.msra.mxu1 %v1439_v12 }
  0x52   :  { %409 = vmatpush2.bf16.msra.mxu0 %v1416_v52  ;;  %843 = vmatprep.subr.bf16.mxu1 %v1444_v13 }
  0x53   :  { %410 = vmatprep.subr.bf16.mxu0 %v1418_v54 }
  0x55   :  { %844 = vmatpush1.bf16.msra.mxu1 %v1442_v14 }
  0x56   :  { %411 = vmatpush2.bf16.msra.mxu0 %v1422_v55  ;;  %845 = vmatprep.subr.bf16.mxu1 %v1447_v15 }
  0x57   :  { %412 = vmatprep.subr.bf16.mxu0 %v1424_v56 }
  0x59   :  { %846 = vmatpush1.bf16.msra.mxu1 %v1445_v16 }
  0x5a   :  { %413 = vmatpush2.bf16.msra.mxu0 %v1426_v57  ;;  %847 = vmatprep.subr.bf16.mxu1 %v1450_v17 }
  0x5d   :  { %415 = vmatmul.mubr.bf16.vlgmr.msra.gmra.mxu0 %v68_v62  ;;  %848 = vmatpush1.bf16.msra.mxu1 %v1448_v18 }
  0x5e   :  { %424 = vmatprep.mubr.bf16.mxu0 %v72_v63  ;;  %849 = vmatprep.subr.bf16.mxu1 %v1453_v19 }
  0x61   :  { %850 = vmatpush2.bf16.msra.mxu1 %v1451_v20 }
  0x62   :  { %851 = vmatprep.subr.bf16.mxu1 %v1456_v21 }
  0x65   :  { %425 = vmatmul.mubr.bf16.gmra.mxu0 %v71_v2  ;;  %852 = vmatpush2.bf16.msra.mxu1 %v1454_v22 }
  0x66   :  { %853 = vmatprep.subr.bf16.mxu1 %v1459_v23 }
  0x69   :  { %854 = vmatpush2.bf16.msra.mxu1 %v1457_v24 }
  0x6a   :  { %855 = vmatprep.subr.bf16.mxu1 %v1462_v25 }
  0x6d   :  { %856 = vmatpush2.bf16.msra.mxu1 %v1460_v26 }
  0x6e   :  { %857 = vmatprep.subr.bf16.mxu1 %v1465_v27 }
  0x71   :  { %858 = vmatpush2.bf16.msra.mxu1 %v1463_v28 }
  0x72   :  { %859 = vmatprep.subr.bf16.mxu1 %v1468_v29 }
  0x75   :  { %860 = vmatpush2.bf16.msra.mxu1 %v1466_v30 }
  0x76   :  { %861 = vmatprep.subr.bf16.mxu1 %v1471_v32 }
  0x79   :  { %862 = vmatpush2.bf16.msra.mxu1 %v1469_v31 }
  0x7a   :  { %863 = vmatprep.subr.bf16.mxu1 %v1474_v33 }
  0x7d   :  { %864 = vmatpush2.bf16.msra.mxu1 %v1472_v34 }
 0x100   :  { %v469_v36 = vpop.f32.mrf.mxu1 }
 0x102   :  { %v471_v38 = vpop.f32.mrf.mxu1 }
 0x104   :  { %v473_v41 = vpop.f32.mrf.mxu1 }
 0x106   :  { %v475_v45 = vpop.f32.mrf.mxu1 }
 0x108   :  { %v479_v50 = vpop.f32.mrf.mxu1 }
 0x10a   :  { %v481_v56 = vpop.f32.mrf.mxu1 }
 0x10c   :  { %v483_v2 = vpop.f32.mrf.mxu1 }
 0x10e   :  { %v485_v13 = vpop.f32.mrf.mxu1 }
 0x11d   :  { %v416_v44 = vpop.f32.mrf.mxu0 }
 0x11e   :  { %v417_v54 = vadd.f32 %v416_v44, %v137_v48 }
 0x11f   :  { %v418_v47 = vpop.f32.mrf.mxu0 }
 0x120   :  { %v419_v58 = vadd.f32 %v418_v47, %v141_v51  ;;  %v470_v62 = vadd.f32 %v469_v36, %v417_v54 }
 0x121   :  { %v420_v49 = vpop.f32.mrf.mxu0 }
 0x122   :  { %v421_v52 = vadd.f32 %v420_v49, %v137_v48  ;;  %v472_v4 = vadd.f32 %v471_v38, %v419_v58 }
 0x123   :  { %v422_v53 = vpop.f32.mrf.mxu0 }
 0x124   :  { %v423_v55 = vadd.f32 %v422_v53, %v141_v51  ;;  %v474_v59 = vadd.f32 %v473_v41, %v421_v52 }
 0x125   :  { %v426_v57 = vpop.f32.mrf.mxu0 }
 0x126   :  { %v427_v60 = vadd.f32 %v426_v57, %v137_v48  ;;  %v476_v63 = vadd.f32 %v475_v45, %v423_v55  ;;  %v488_v5 = vadd.f32 %v474_v59, %v470_v62 }
 0x127   :  { %v428_v61 = vpop.f32.mrf.mxu0 }
 0x128   :  { %v480_v0 = vadd.f32 %v479_v50, %v427_v60  ;;  %v429_v1 = vadd.f32 %v428_v61, %v141_v51  ;;  %v497_v9 = vadd.f32 %v476_v63, %v472_v4 }
 0x129   :  { %v430_v3 = vpop.f32.mrf.mxu0 }
 0x12a   :  { %v482_v6 = vadd.f32 %v481_v56, %v429_v1  ;;  %v431_v7 = vadd.f32 %v430_v3, %v137_v48  ;;  %v489_v10 = vadd.f32 %v488_v5, %v480_v0 }
 0x12b   :  { %v432_v8 = vpop.f32.mrf.mxu0 }
 0x12c   :  { %v484_v11 = vadd.f32 %v483_v2, %v431_v7  ;;  %v433_v12 = vadd.f32 %v432_v8, %v141_v51  ;;  %v498_v14 = vadd.f32 %v497_v9, %v482_v6 }
 0x12e   :  { %v490_v15 = vadd.f32 %v489_v10, %v484_v11  ;;  %v486_v16 = vadd.f32 %v485_v13, %v433_v12  ;;  %v1684_v10 = vsub.s32 1, %v1661_v37  ;;  %v563_v12 = vsub.s32 5, %v1661_v37 }
 0x12f   :  { %v589_v13 = vsub.s32 6, %v1661_v37 }
 0x130   :  { %v491_v17 = vrot.slane %v490_v15, 4  ;;  %v499_v18 = vadd.f32 %v498_v14, %v486_v16  ;;  %v560_v14 = vrot.slane %v1669_v40, %v1684_v10 }
 0x132   :  { %v492_v19 = vadd.f32 %v491_v17, %v490_v15  ;;  %v500_v20 = vrot.slane %v499_v18, 4  ;;  %v590_v17 = vrot.slane %v1669_v40, %v589_v13 }
 0x134   :  { %v493_v21 = vrot.slane %v492_v19, 2  ;;  %v501_v22 = vadd.f32 %v500_v20, %v499_v18  ;;  %v570_v18 = vrot.slane %v560_v14, %v1684_v10  ;;  %v1486_v14 = vld [vmem:[%s1794_s5 + $0x10] sm:$0xff]  }
 0x136   :  { %v494_v23 = vadd.f32 %v493_v21, %v492_v19  ;;  %v502_v24 = vrot.slane %v501_v22, 2 }
 0x138   :  { %v495_v25 = vrot.slane %v494_v23, 1  ;;  %v503_v26 = vadd.f32 %v502_v24, %v501_v22 }
 0x13a   :  { %v496_v27 = vadd.f32 %v495_v25, %v494_v23  ;;  %v504_v28 = vrot.slane %v503_v26, 1 }
 0x13c   :  { %v507_v29 = vmul.f32 0.03125, %v496_v27  ;;  %v505_v30 = vadd.f32 %v504_v28, %v503_v26 }
 0x13e   :  { %v509_v31 = vsub.f32 %v470_v62, %v507_v29  ;;  %v511_v32 = vsub.f32 %v474_v59, %v507_v29  ;;  %v1679_v33 = vsub.f32 %v480_v0, %v507_v29  ;;  %v508_v34 = vmul.f32 0.03125, %v505_v30 }
 0x13f   :  { %v515_v35 = vsub.f32 %v484_v11, %v507_v29  ;;  %v1687_v11 = vsub.s32 2, %v1661_v37 }
 0x140   :  { %v517_v36 = vmul.f32 %v509_v31, %v509_v31  ;;  %v519_v38 = vmul.f32 %v511_v32, %v511_v32  ;;  %v510_v41 = vsub.f32 %v472_v4, %v508_v34  ;;  %v512_v43 = vsub.f32 %v476_v63, %v508_v34 }
 0x141   :  { %v514_v44 = vsub.f32 %v482_v6, %v508_v34  ;;  %v521_v45 = vmul.f32 %v1679_v33, %v1679_v33  ;;  %v516_v47 = vsub.f32 %v486_v16, %v508_v34  ;;  %v523_v50 = vmul.f32 %v515_v35, %v515_v35 }
 0x142   :  { %v525_v46 = vadd.f32 %v519_v38, %v517_v36  ;;  %v518_v48 = vmul.f32 %v510_v41, %v510_v41  ;;  %v520_v49 = vmul.f32 %v512_v43, %v512_v43  ;;  %v586_v15 = vrot.slane %v1669_v40, %v1687_v11 }
 0x143   :  { %v522_v52 = vmul.f32 %v514_v44, %v514_v44  ;;  %v524_v55 = vmul.f32 %v516_v47, %v516_v47  ;;  %v564_v16 = vrot.slane %v1669_v40, %v563_v12  ;;  %v600_v25 = vrot.slane %v590_v17, %v1687_v11  ;;  %v1489_v17 = vld [vmem:[%s1794_s5 + $0x40] sm:$0xff]  }
 0x144   :  { %v526_v51 = vadd.f32 %v525_v46, %v521_v45  ;;  %v534_v53 = vadd.f32 %v520_v49, %v518_v48  ;;  %v596_v22 = vrot.slane %v586_v15, %v1687_v11  ;;  %v1487_v15 = vld [vmem:[%s1794_s5 + $0x48] sm:$0xff]  }
 0x145   :  { %v574_v23 = vrot.slane %v564_v16, %v1684_v10  ;;  %v1488_v16 = vld [vmem:[%s1794_s5 + $0x8] sm:$0xff]  }
 0x146   :  { %v527_v54 = vadd.f32 %v526_v51, %v523_v50  ;;  %v535_v56 = vadd.f32 %v534_v53, %v522_v52 }
 0x148   :  { %v528_v57 = vrot.slane %v527_v54, 4  ;;  %v536_v58 = vadd.f32 %v535_v56, %v524_v55 }
 0x14a   :  { %v529_v59 = vadd.f32 %v528_v57, %v527_v54  ;;  %v537_v60 = vrot.slane %v536_v58, 4 }
 0x14c   :  { %v530_v61 = vrot.slane %v529_v59, 2  ;;  %v538_v62 = vadd.f32 %v537_v60, %v536_v58 }
 0x14e   :  { %v531_v63 = vadd.f32 %v530_v61, %v529_v59  ;;  %v539_v0 = vrot.slane %v538_v62, 2 }
 0x150   :  { %v532_v1 = vrot.slane %v531_v63, 1  ;;  %v540_v2 = vadd.f32 %v539_v0, %v538_v62  ;;  %v1476_v0 = vld [vmem:[%s1794_s5 + $0x38] sm:$0xff]  }
 0x152   :  { %v533_v3 = vadd.f32 %v532_v1, %v531_v63  ;;  %v541_v4 = vrot.slane %v540_v2, 1  ;;  %v1475_v63 = vld [vmem:[%s1794_s5 + $0x78] sm:$0xff]   ;;  %v1477_v1 = vld [vmem:[%s1794_s5 + $0x70] sm:$0xff]  }
 0x153   :  { %1321 = vmatprep.subr.bf16.mxu0 %v1475_v63 }
 0x154   :  { %v543_v5 = vmul.f32 0.03125, %v533_v3  ;;  %v542_v6 = vadd.f32 %v541_v4, %v540_v2  ;;  %1322 = vmatpush3.bf16.msra.mxu0 %v1476_v0  ;;  %v1478_v2 = vld [vmem:[%s1794_s5 + $0x30] sm:$0xff]   ;;  %v1479_v3 = vld [vmem:[%s1794_s5 + $0x68] sm:$0xff]  }
 0x155   :  { %1323 = vmatprep.subr.bf16.mxu0 %v1477_v1  ;;  %v1480_v4 = vld [vmem:[%s1794_s5 + $0x28] sm:$0xff]  }
 0x156   :  { %v545_v7 = vadd.f32 1e-05, %v543_v5  ;;  %v544_v8 = vmul.f32 0.03125, %v542_v6  ;;  %v1481_v5 = vld [vmem:[%s1794_s5 + $0x60] sm:$0xff]  }
 0x157   :  { %v1482_v6 = vld [vmem:[%s1794_s5 + $0x20] sm:$0xff]  }
 0x158   :  { %1491 = vrsqrt.f32 %v545_v7  ;;  %v546_v9 = vadd.f32 1e-05, %v544_v8  ;;  %1324 = vmatpush3.bf16.msra.mxu0 %v1478_v2  ;;  %v1483_v7 = vld [vmem:[%s1794_s5 + $0x58] sm:$0xff]  }
 0x159   :  { %1325 = vmatprep.subr.bf16.mxu0 %v1479_v3  ;;  %v1484_v8 = vld [vmem:[%s1794_s5 + $0x18] sm:$0xff]  }
 0x15a   :  { %1493 = vrsqrt.f32 %v546_v9  ;;  %v1485_v9 = vld [vmem:[%s1794_s5 + $0x50] sm:$0xff]  }
 0x15c   :  { %1326 = vmatpush3.bf16.msra.mxu0 %v1480_v4 }
 0x15d   :  { %1327 = vmatprep.subr.bf16.mxu0 %v1481_v5 }
 0x160   :  { %1328 = vmatpush3.bf16.msra.mxu0 %v1482_v6 }
 0x161   :  { %1329 = vmatprep.subr.bf16.mxu0 %v1483_v7 }
 0x164   :  { %1330 = vmatpush3.bf16.msra.mxu0 %v1484_v8 }
 0x165   :  { %v1492_v19 = vpop.eup %1491  ;;  %1331 = vmatprep.subr.bf16.mxu0 %v1485_v9 }
 0x166   :  { %v549_v20 = vmul.f32 %v1492_v19, %v509_v31  ;;  %v551_v21 = vmul.f32 %v1492_v19, %v511_v32  ;;  %v555_v36 = vmul.f32 %v1492_v19, %v515_v35  ;;  %v553_v45 = vmul.f32 %v1492_v19, %v1679_v33  ;;  %v1757_v19 = vld [vmem:[%s1793_s4] sm:$0x77] }
 0x167   :  { %v1494_v24 = vpop.eup %1493 }
 0x168   :  { %v575_v26 = vmul.f32 %v570_v18, %v549_v20  ;;  %v577_v27 = vmul.f32 %v570_v18, %v551_v21  ;;  %v556_v28 = vmul.f32 %v1494_v24, %v516_v47  ;;  %v550_v29 = vmul.f32 %v1494_v24, %v510_v41  ;;  %1332 = vmatpush3.bf16.msra.mxu0 %v1486_v14 }
 0x169   :  { %v552_v30 = vmul.f32 %v1494_v24, %v512_v43  ;;  %v554_v34 = vmul.f32 %v1494_v24, %v514_v44  ;;  %v579_v55 = vmul.f32 %v570_v18, %v553_v45  ;;  %v581_v47 = vmul.f32 %v570_v18, %v555_v36  ;;  %1333 = vmatprep.subr.bf16.mxu0 %v1487_v15  ;;  %v1490_v18 = vld [vmem:[%s1794_s5] sm:$0xff]  }
 0x16a   :  { %v601_v40 = vadd.f32 %v596_v22, %v575_v26  ;;  %v603_v38 = vadd.f32 %v596_v22, %v577_v27  ;;  %v576_v31 = vmul.f32 %v574_v23, %v550_v29  ;;  %v582_v48 = vmul.f32 %v574_v23, %v556_v28 }
 0x16b   :  { %v578_v32 = vmul.f32 %v574_v23, %v552_v30  ;;  %v580_v46 = vmul.f32 %v574_v23, %v554_v34  ;;  %v605_v58 = vadd.f32 %v596_v22, %v579_v55  ;;  %v607_v33 = vadd.f32 %v596_v22, %v581_v47 }
 0x16c   :  { %v602_v49 = vadd.f32 %v600_v25, %v576_v31  ;;  %v608_v52 = vadd.f32 %v600_v25, %v582_v48  ;;  %v609_v53 = vmax.f32 %v601_v40, 0.0  ;;  %v611_v54 = vmax.f32 %v603_v38, 0.0  ;;  %1334 = vmatpush3.bf16.msra.mxu0 %v1488_v16 }
 0x16d   :  { %v604_v50 = vadd.f32 %v600_v25, %v578_v32  ;;  %v606_v51 = vadd.f32 %v600_v25, %v580_v46  ;;  %v613_v60 = vmax.f32 %v605_v58, 0.0  ;;  %v615_v61 = vmax.f32 %v607_v33, 0.0  ;;  %1335 = vmatprep.subr.bf16.mxu0 %v1489_v17 }
 0x16e   :  { %v610_v41 = vmax.f32 %v602_v49, 0.0  ;;  %v616_v35 = vmax.f32 %v608_v52, 0.0  ;;  %v617_v57 = vpack.c.bf16 %v611_v54, %v609_v53  ;;  %v658_v21 = vrot.slane %v1757_v19, %v1664_v39 }
 0x16f   :  { %v612_v43 = vmax.f32 %v604_v50, 0.0  ;;  %v614_v44 = vmax.f32 %v606_v51, 0.0  ;;  %v619_v62 = vpack.c.bf16 %v615_v61, %v613_v60  ;;  %v662_v23 = vrot.slane %v1757_v19, %v130_v42 }
 0x170   :  { %1336 = vmatpush3.bf16.msra.mxu0 %v1490_v18  ;;  %v668_v25 = vrot.slane %v658_v21, %v1664_v39 }
 0x171   :  { %v618_v56 = vpack.c.bf16 %v612_v43, %v610_v41  ;;  %v620_v59 = vpack.c.bf16 %v616_v35, %v614_v44  ;;  %v672_v27 = vrot.slane %v662_v23, %v1664_v39 }
 0x173   :  { %865 = vmatprep.mubr.bf16.mxu1 %v618_v56 }
 0x174   :  { %866 = vmatmul.mubr.bf16.vlgmr.msra.gmra.mxu1 %v617_v57 }
 0x175   :  { %875 = vmatprep.mubr.bf16.mxu1 %v620_v59 }
 0x17c   :  { %876 = vmatmul.mubr.bf16.gmra.mxu1 %v619_v62 }
 0x234   :  { %v867_v20 = vpop.f32.mrf.mxu1 }
 0x235   :  { %v868_v30 = vadd.f32 %v867_v20, %v668_v25 }
 0x236   :  { %v869_v22 = vpop.f32.mrf.mxu1 }
 0x237   :  { %v870_v38 = vadd.f32 %v869_v22, %v672_v27 }
 0x238   :  { %v871_v24 = vpop.f32.mrf.mxu1 }
 0x239   :  { %v872_v28 = vadd.f32 %v871_v24, %v668_v25 }
 0x23a   :  { %v873_v26 = vpop.f32.mrf.mxu1 }
 0x23b   :  { %v874_v34 = vadd.f32 %v873_v26, %v672_v27  ;;  %v886_v45 = vadd.f32 %v872_v28, %v868_v30 }
 0x23c   :  { %v877_v29 = vpop.f32.mrf.mxu1 }
 0x23d   :  { %v878_v36 = vadd.f32 %v877_v29, %v668_v25  ;;  %v895_v46 = vadd.f32 %v874_v34, %v870_v38 }
 0x23e   :  { %v879_v40 = vpop.f32.mrf.mxu1 }
 0x23f   :  { %v880_v31 = vadd.f32 %v879_v40, %v672_v27  ;;  %v887_v48 = vadd.f32 %v886_v45, %v878_v36 }
 0x240   :  { %v881_v32 = vpop.f32.mrf.mxu1 }
 0x241   :  { %v882_v49 = vadd.f32 %v881_v32, %v668_v25  ;;  %v896_v50 = vadd.f32 %v895_v46, %v880_v31 }
 0x242   :  { %v883_v42 = vpop.f32.mrf.mxu1 }
 0x243   :  { %v888_v51 = vadd.f32 %v887_v48, %v882_v49  ;;  %v884_v52 = vadd.f32 %v883_v42, %v672_v27  ;;  %v983_v42 = vrot.slane %v1757_v19, %v1687_v11 }
 0x245   :  { %v889_v53 = vrot.slane %v888_v51, 4  ;;  %v897_v54 = vadd.f32 %v896_v50, %v884_v52  ;;  %v961_v50 = vrot.slane %v1757_v19, %v563_v12 }
 0x247   :  { %v890_v39 = vadd.f32 %v889_v53, %v888_v51  ;;  %v898_v55 = vrot.slane %v897_v54, 4 }
 0x249   :  { %v891_v47 = vrot.slane %v890_v39, 2  ;;  %v899_v41 = vadd.f32 %v898_v55, %v897_v54  ;;  %v993_v55 = vrot.slane %v983_v42, %v1687_v11 }
 0x24b   :  { %v892_v43 = vadd.f32 %v891_v47, %v890_v39  ;;  %v900_v44 = vrot.slane %v899_v41, 2  ;;  %v971_v47 = vrot.slane %v961_v50, %v1684_v10 }
 0x24d   :  { %v893_v35 = vrot.slane %v892_v43, 1  ;;  %v901_v56 = vadd.f32 %v900_v44, %v899_v41 }
 0x24f   :  { %v894_v57 = vadd.f32 %v893_v35, %v892_v43  ;;  %v902_v58 = vrot.slane %v901_v56, 1 }
 0x251   :  { %v904_v33 = vmul.f32 0.03125, %v894_v57  ;;  %v903_v59 = vadd.f32 %v902_v58, %v901_v56 }
 0x253   :  { %v906_v60 = vsub.f32 %v868_v30, %v904_v33  ;;  %v908_v61 = vsub.f32 %v872_v28, %v904_v33  ;;  %v910_v62 = vsub.f32 %v878_v36, %v904_v33  ;;  %v905_v63 = vmul.f32 0.03125, %v903_v59 }
 0x254   :  { %v912_v0 = vsub.f32 %v882_v49, %v904_v33  ;;  %v957_v49 = vrot.slane %v1757_v19, %v1684_v10 }
 0x255   :  { %v914_v1 = vmul.f32 %v906_v60, %v906_v60  ;;  %v916_v2 = vmul.f32 %v908_v61, %v908_v61  ;;  %v907_v3 = vsub.f32 %v870_v38, %v905_v63  ;;  %v909_v4 = vsub.f32 %v874_v34, %v905_v63 }
 0x256   :  { %v911_v5 = vsub.f32 %v880_v31, %v905_v63  ;;  %v918_v6 = vmul.f32 %v910_v62, %v910_v62  ;;  %v913_v8 = vsub.f32 %v884_v52, %v905_v63  ;;  %v920_v15 = vmul.f32 %v912_v0, %v912_v0 }
 0x257   :  { %v922_v7 = vadd.f32 %v916_v2, %v914_v1  ;;  %v915_v9 = vmul.f32 %v907_v3, %v907_v3  ;;  %v917_v14 = vmul.f32 %v909_v4, %v909_v4  ;;  %v967_v51 = vrot.slane %v957_v49, %v1684_v10 }
 0x258   :  { %v919_v17 = vmul.f32 %v911_v5, %v911_v5  ;;  %v921_v21 = vmul.f32 %v913_v8, %v913_v8  ;;  %v987_v52 = vrot.slane %v1757_v19, %v589_v13 }
 0x259   :  { %v923_v16 = vadd.f32 %v922_v7, %v918_v6  ;;  %v931_v18 = vadd.f32 %v917_v14, %v915_v9 }
 0x25a   :  { %v997_v43 = vrot.slane %v987_v52, %v1687_v11 }
 0x25b   :  { %v924_v20 = vadd.f32 %v923_v16, %v920_v15  ;;  %v932_v22 = vadd.f32 %v931_v18, %v919_v17 }
 0x25d   :  { %v925_v23 = vrot.slane %v924_v20, 4  ;;  %v933_v24 = vadd.f32 %v932_v22, %v921_v21 }
 0x25f   :  { %v926_v25 = vadd.f32 %v925_v23, %v924_v20  ;;  %v934_v26 = vrot.slane %v933_v24, 4  ;;  %v1304_v23 = vld [vmem:[%s1795_s6] ss:$0 sm:$0xff]  ;;  %s1539_s6 = scalar_lea.vmem %s1212_s22, 512 }
 0x260   :  { %p1540_p10 = scmp.ne.s32.totalorder %s1212_s22, %s1539_s6  ;;  %p1545_p12 = scmp.lt.s32.totalorder %s1539_s6, %s1539_s6 }
 0x261   :  { %v927_v27 = vrot.slane %v926_v25, 2  ;;  %v935_v28 = vadd.f32 %v934_v26, %v933_v24 }
 0x262   :  { %p1546_p13 = por %p1545_p12, %p1544_p11 }
 0x263   :  { %v928_v29 = vadd.f32 %v927_v27, %v926_v25  ;;  %v936_v30 = vrot.slane %v935_v28, 2 }
 0x264   :  { %p1547_p0 = pnand %p1546_p13, %p1540_p10 }
 0x265   :  { %v929_v34 = vrot.slane %v928_v29, 1  ;;  %v937_v36 = vadd.f32 %v936_v30, %v935_v28 }
 0x267   :  { %v930_v40 = vadd.f32 %v929_v34, %v928_v29  ;;  %v938_v38 = vrot.slane %v937_v36, 1 }
 0x269   :  { %v940_v45 = vmul.f32 0.03125, %v930_v40  ;;  %v939_v31 = vadd.f32 %v938_v38, %v937_v36 }
 0x26b   :  { %v942_v32 = vadd.f32 1e-05, %v940_v45  ;;  %v941_v46 = vmul.f32 0.03125, %v939_v31 }
 0x26d   :  { %1495 = vrsqrt.f32 %v942_v32  ;;  %v943_v48 = vadd.f32 1e-05, %v941_v46 }
 0x26f   :  { %1497 = vrsqrt.f32 %v943_v48 }
 0x27a   :  { %v1496_v53 = vpop.eup %1495 }
 0x27b   :  { %v946_v54 = vmul.f32 %v1496_v53, %v906_v60  ;;  %v948_v39 = vmul.f32 %v1496_v53, %v908_v61  ;;  %v952_v33 = vmul.f32 %v1496_v53, %v912_v0  ;;  %v950_v13 = vmul.f32 %v1496_v53, %v910_v62 }
 0x27c   :  { %v1498_v41 = vpop.eup %1497 }
 0x27d   :  { %v972_v44 = vmul.f32 %v967_v51, %v946_v54  ;;  %v974_v35 = vmul.f32 %v967_v51, %v948_v39  ;;  %v953_v56 = vmul.f32 %v1498_v41, %v913_v8  ;;  %v947_v12 = vmul.f32 %v1498_v41, %v907_v3 }
 0x27e   :  { %v949_v57 = vmul.f32 %v1498_v41, %v909_v4  ;;  %v951_v58 = vmul.f32 %v1498_v41, %v911_v5  ;;  %v978_v7 = vmul.f32 %v967_v51, %v952_v33  ;;  %v976_v14 = vmul.f32 %v967_v51, %v950_v13 }
 0x27f   :  { %v998_v37 = vadd.f32 %v993_v55, %v972_v44  ;;  %v1000_v59 = vadd.f32 %v993_v55, %v974_v35  ;;  %v979_v19 = vmul.f32 %v971_v47, %v953_v56  ;;  %v973_v60 = vmul.f32 %v971_v47, %v947_v12 }
 0x280   :  { %v975_v61 = vmul.f32 %v971_v47, %v949_v57  ;;  %v977_v63 = vmul.f32 %v971_v47, %v951_v58  ;;  %v1002_v16 = vadd.f32 %v993_v55, %v976_v14  ;;  %v1004_v62 = vadd.f32 %v993_v55, %v978_v7 }
 0x281   :  { %v999_v1 = vadd.f32 %v997_v43, %v973_v60  ;;  %v1005_v6 = vadd.f32 %v997_v43, %v979_v19  ;;  %v1006_v11 = vmax.f32 %v998_v37, 0.0  ;;  %v1008_v9 = vmax.f32 %v1000_v59, 0.0 }
 0x282   :  { %v1001_v2 = vadd.f32 %v997_v43, %v975_v61  ;;  %v1003_v10 = vadd.f32 %v997_v43, %v977_v63  ;;  %v1010_v18 = vmax.f32 %v1002_v16, 0.0  ;;  %v1012_v20 = vmax.f32 %v1004_v62, 0.0 }
 0x283   :  { %v1007_v8 = vmax.f32 %v999_v1, 0.0  ;;  %v1013_v5 = vmax.f32 %v1005_v6, 0.0  ;;  %v1014_v15 = vpack.c.bf16 %v1008_v9, %v1006_v11 }
 0x284   :  { %v1009_v3 = vmax.f32 %v1001_v2, 0.0  ;;  %v1011_v4 = vmax.f32 %v1003_v10, 0.0  ;;  %v1016_v21 = vpack.c.bf16 %v1012_v20, %v1010_v18 }
 0x286   :  { %v1015_v0 = vpack.c.bf16 %v1009_v3, %v1007_v8  ;;  %v1017_v17 = vpack.c.bf16 %v1013_v5, %v1011_v4 }
 0x288   :  { %1185 = vmatprep.mubr.bf16.mxu0 %v1015_v0 }
 0x289   :  { %1186 = vmatmul.mubr.bf16.vlgmr.msra.gmra.mxu0 %v1014_v15 }
 0x28a   :  { %1193 = vmatprep.mubr.bf16.mxu0 %v1017_v17 }
 0x291   :  { %1194 = vmatmul.mubr.bf16.gmra.mxu0 %v1016_v21 }
 0x349   :  { %v1337_v22 = vpop.f32.mrf.mxu0 }
 0x34b   :  { %v1338_v24 = vpop.f32.mrf.mxu0 }
 0x34c   :  { %v1339_v25 = vadd.f32 %v1338_v24, %v1337_v22 }
 0x34d   :  { %v1340_v26 = vpop.f32.mrf.mxu0 }
 0x34e   :  { %v1188_v27 = vadd.f32 %v1339_v25, %v1304_v23 }
 0x34f   :  { %v1341_v28 = vpop.f32.mrf.mxu0 }
 0x350   :  { %1202 = vst [vmem:[#allocation7] sm:$0xff] %v1188_v27  ;;  %v1342_v29 = vadd.f32 %v1341_v28, %v1340_v26 }
 0x351   :  { %v1343_v30 = vpop.f32.mrf.mxu0 }
 0x352   :  { %v1191_v34 = vadd.f32 %v1342_v29, %v1304_v23 }
 0x353   :  { %v1344_v36 = vpop.f32.mrf.mxu0 }
 0x354   :  { %1203 = vst [vmem:[#allocation7 + $0x8] sm:$0xff] %v1191_v34  ;;  %v1345_v40 = vadd.f32 %v1344_v36, %v1343_v30 }
 0x355   :  { %v1346_v38 = vpop.f32.mrf.mxu0 }
 0x356   :  { %v1196_v45 = vadd.f32 %v1345_v40, %v1304_v23 }
 0x357   :  { %v1347_v31 = vpop.f32.mrf.mxu0 }
 0x358   :  { %1204 = vst [vmem:[#allocation7 + $0x10] sm:$0xff] %v1196_v45  ;;  %v1348_v32 = vadd.f32 %v1347_v31, %v1346_v38 }
 0x35a   :  { %v1199_v46 = vadd.f32 %v1348_v32, %v1304_v23 }
 0x35c   :  { %1205 = vst [vmem:[#allocation7 + $0x18] sm:$0xff] %v1199_v46 }
 0x35d   :  { %1550 = shalt.err (!%p1547_p0)
}
 0x35e   :  { %1217 = dma.vmem_to_hbm [thread:$0]  %s1212_s22, 512, %s1796_s7, [#allocation4], %s1566_s27, %s1566_s27, %s1567_s28  }
 0x35f   :  { %1563 = dma.done.wait [#allocation4], 512  }
 0x360   :  { %1564 = vsyncadd [#allocation4], 4294966784 }
 0x361   :  { %1221 = vsyncpa [#allocation3], 1 }
 0x362   :  { %1222 = vsyncpa [#allocation6], 1 }
 0x363   :  { %1223 = vsyncpa [#allocation4], 1 }

</bundles_post_ra>
